<compile_context>
chip_gen: v5e
topology: v5e:2x2
jax: 0.10.0
libtpu: 0.0.40
codegen_flags: <defaults>
</compile_context>

<pallas_src>
import jax
import jax.numpy as jnp
from jax.experimental import pallas as pl
from jax.experimental.pallas import tpu as pltpu

# `patch_size` is a module-level global in the original PyTorch code (Pangu default).
PATCH_SIZE = (2, 4, 4)


def _matmul_bias_kernel(x_ref, w_ref, b_ref, o_ref):
    # x_ref: (TM, C)   w_ref: (C, N)   b_ref: (1, N)   o_ref: (TM, N)
    # Operands stay in their native dtype (bf16-friendly MXU path); accumulate in f32.
    acc = jnp.dot(x_ref[...], w_ref[...], preferred_element_type=jnp.float32)
    acc = acc + b_ref[...].astype(jnp.float32)
    o_ref[...] = acc.astype(o_ref.dtype)


def _round_up(a, b):
    return ((a + b - 1) // b) * b


def _token_matmul_bias(x2d, w, b, *, tm=256):
    """(T, C) @ (C, N) + b, tiled over the token dim with VMEM-resident weights."""
    T, C = x2d.shape
    N = w.shape[1]

    # TM multiple of 8 (sublane); 256 default (fills the 2x256 MXU height on v6e/v7x).
    tm = min(tm, _round_up(max(T, 8), 8))   # don't over-pad tiny test shapes
    T_pad = _round_up(T, tm)
    if T_pad != T:
        x2d = jnp.pad(x2d, ((0, T_pad - T), (0, 0)))

    out = pl.pallas_call(
        _matmul_bias_kernel,
        out_shape=jax.ShapeDtypeStruct((T_pad, N), x2d.dtype),
        grid_spec=pltpu.PrefetchScalarGridSpec(
            num_scalar_prefetch=0,
            grid=(T_pad // tm,),
            in_specs=[
                pl.BlockSpec((tm, C), lambda i: (i, 0)),   # streamed token tile
                pl.BlockSpec((C, N), lambda i: (0, 0)),    # resident weight
                pl.BlockSpec((1, N), lambda i: (0, 0)),    # resident bias
            ],
            out_specs=pl.BlockSpec((tm, N), lambda i: (i, 0)),
        ),
        compiler_params=pltpu.CompilerParams(
            dimension_semantics=("parallel",)),            # token tiles independent
    )(x2d, w, b)
    return out[:T]


def patch_recovery_forward(x, Z, H, W, params, *, tm=256):
    """x: (B, Z*H*W, C). Returns (output, output_surface) as in the torch module."""
    B, L, C = x.shape
    assert L == Z * H * W and Z >= 2
    pZ, pH, pW = params["patch_size"]
    o3 = params["w_conv"].shape[1]            # 5
    o2 = params["w_conv_surface"].shape[1]    # 4

    # torch: permute(0,2,1).reshape(B, C, Z, H, W) == tokens ordered (z, h, w)
    x5 = x.reshape(B, Z, H, W, C)

    # ---------------- upper-air path: ConvTranspose3d on levels 1: ----------------
    x_air = x5[:, 1:].reshape(-1, C)                                    # (B*(Z-1)*H*W, C)
    w3 = params["w_conv"].reshape(C, o3 * pZ * pH * pW).astype(x.dtype)  # (in,out,kz,kh,kw) -> (C,N)
    b3 = jnp.repeat(params["b_conv"], pZ * pH * pW).reshape(1, -1)
    y = _token_matmul_bias(x_air, w3, b3, tm=tm)                        # (T, o3*pZ*pH*pW)
    y = y.reshape(B, Z - 1, H, W, o3, pZ, pH, pW)
    y = y.transpose(0, 4, 1, 5, 2, 6, 3, 7)                             # (B,o,z,dz,h,dh,w,dw)
    output = y.reshape(B, o3, (Z - 1) * pZ, H * pH, W * pW)

    # ---------------- surface path: ConvTranspose2d on level 0 --------------------
    x_sfc = x5[:, 0].reshape(-1, C)                                     # (B*H*W, C)
    w2 = params["w_conv_surface"].reshape(C, o2 * pH * pW).astype(x.dtype)
    b2 = jnp.repeat(params["b_conv_surface"], pH * pW).reshape(1, -1)
    ys = _token_matmul_bias(x_sfc, w2, b2, tm=tm)                       # (T, o2*pH*pW)
    ys = ys.reshape(B, H, W, o2, pH, pW).transpose(0, 3, 1, 4, 2, 5)
    output_surface = ys.reshape(B, o2, H * pH, W * pW)

    # TODO(synk): Crop3D is defined outside the provided module (it removes padding added at
    # patch-embedding time); with no pad amounts in the spec it is treated as identity here.
    return output, output_surface


def init_params(key, dim, patch_size=PATCH_SIZE):
    """Weights stored in the torch ConvTransposeNd layout: (in_channels, out_channels, *kernel)."""
    pZ, pH, pW = patch_size
    k1, k2, k3, k4 = jax.random.split(key, 4)
    bound3 = 1.0 / jnp.sqrt(dim * pZ * pH * pW)
    bound2 = 1.0 / jnp.sqrt(dim * pH * pW)
    w_conv = jax.random.uniform(k1, (dim, 5, pZ, pH, pW), jnp.float32, -bound3, bound3)
    b_conv = jax.random.uniform(k2, (5,), jnp.float32, -bound3, bound3)
    w_conv_surface = jax.random.uniform(k3, (dim, 4, pH, pW), jnp.float32, -bound2, bound2)
    b_conv_surface = jax.random.uniform(k4, (4,), jnp.float32, -bound2, bound2)
    return {"patch_size": patch_size, "w_conv": w_conv, "b_conv": b_conv,
            "w_conv_surface": w_conv_surface, "b_conv_surface": b_conv_surface}


if __name__ == "__main__":
    key = jax.random.PRNGKey(0)
    kx, kp = jax.random.split(key)

    B, Z, H, W, dim = 2, 3, 4, 4, 128
    pZ, pH, pW = PATCH_SIZE
    x = jax.random.normal(kx, (B, Z * H * W, dim), jnp.float32)
    params = init_params(kp, dim)

    out, out_sfc = patch_recovery_forward(x, Z, H, W, params)
    jax.block_until_ready((out, out_sfc))

    # ---- plain-JAX reference: direct transposed-conv math (stride == kernel) ----
    x5 = x.reshape(B, Z, H, W, dim)
    xs3 = x5[:, 1:].transpose(0, 4, 1, 2, 3)                     # (B, C, Z-1, H, W)
    ref3 = jnp.einsum("bczhw,codef->bozdhewf", xs3, params["w_conv"],
                      precision=jax.lax.Precision.HIGHEST)
    ref3 = ref3.reshape(B, 5, (Z - 1) * pZ, H * pH, W * pW) \
        + params["b_conv"][None, :, None, None, None]
    xs2 = x5[:, 0].transpose(0, 3, 1, 2)                         # (B, C, H, W)
    ref2 = jnp.einsum("bchw,coef->bohewf", xs2, params["w_conv_surface"],
                      precision=jax.lax.Precision.HIGHEST)
    ref2 = ref2.reshape(B, 4, H * pH, W * pW) \
        + params["b_conv_surface"][None, :, None, None]

    assert out.shape == (B, 5, (Z - 1) * pZ, H * pH, W * pW)
    assert out_sfc.shape == (B, 4, H * pH, W * pW)
    assert jnp.allclose(out, ref3, atol=1e-3, rtol=1e-3), "upper-air output mismatch"
    assert jnp.allclose(out_sfc, ref2, atol=1e-3, rtol=1e-3), "surface output mismatch"

    print("KERNEL_OK")
</pallas_src>

<mosaic_0001>
module attributes {stable_mosaic.version = 11 : i64} {
  func.func @_matmul_bias_kernel(%arg0: i32, %arg1: memref<64x128xf32, #tpu.memory_space<vmem>>, %arg2: memref<128x160xf32, #tpu.memory_space<vmem>>, %arg3: memref<1x160xf32, #tpu.memory_space<vmem>>, %arg4: memref<64x160xf32, #tpu.memory_space<vmem>>) attributes {dimension_semantics = [#tpu.dimension_semantics<parallel>], iteration_bounds = array<i64: 1>, scalar_prefetch = 0 : i64, scratch_operands = 0 : i64, tpu.core_type = #tpu.core_type<tc>, window_params = [{transform_indices = @transform_0, window_bounds = array<i64: 64, 128>}, {pipeline_mode = #tpu.pipeline_mode<synchronous>, transform_indices = @transform_1, window_bounds = array<i64: 128, 160>}, {pipeline_mode = #tpu.pipeline_mode<synchronous>, transform_indices = @transform_2, window_bounds = array<i64: 1, 160>}, {transform_indices = @transform_3, window_bounds = array<i64: 64, 160>}]} {
    %c0 = arith.constant 0 : index
    %c0_0 = arith.constant 0 : index
    %0 = vector.load %arg1[%c0, %c0_0] : memref<64x128xf32, #tpu.memory_space<vmem>>, vector<64x128xf32>
    %c0_1 = arith.constant 0 : index
    %c0_2 = arith.constant 0 : index
    %1 = vector.load %arg2[%c0_1, %c0_2] : memref<128x160xf32, #tpu.memory_space<vmem>>, vector<128x160xf32>
    %cst = arith.constant dense<0.000000e+00> : vector<64x160xf32>
    %2 = tpu.matmul %0, %1, %cst {dimension_numbers = #tpu.dot_dimension_numbers<[1], [0], [0], [1], [0, 0, 1, 1], [], []>} : vector<64x128xf32>, vector<128x160xf32>, vector<64x160xf32> -> vector<64x160xf32>
    %c0_3 = arith.constant 0 : index
    %c0_4 = arith.constant 0 : index
    %3 = vector.load %arg3[%c0_3, %c0_4] : memref<1x160xf32, #tpu.memory_space<vmem>>, vector<1x160xf32>
    %4 = vector.broadcast %3 : vector<1x160xf32> to vector<64x160xf32>
    %5 = arith.addf %2, %4 : vector<64x160xf32>
    %c0_5 = arith.constant 0 : index
    %c0_6 = arith.constant 0 : index
    %6 = vector.load %arg4[%c0_5, %c0_6] : memref<64x160xf32, #tpu.memory_space<vmem>>, vector<64x160xf32>
    tpu.vector_store %arg4[%c0_5, %c0_6], %5 {strides = array<i32>} : memref<64x160xf32, #tpu.memory_space<vmem>>, vector<64x160xf32>,
    return
  }
  func.func @transform_0(%arg0: i32) -> (i32, i32) {
    %c0_i32 = arith.constant 0 : i32
    %c0_i32_0 = arith.constant 0 : i32
    return %arg0, %c0_i32 : i32, i32
  }
  func.func @transform_1(%arg0: i32) -> (i32, i32) {
    %c0_i32 = arith.constant 0 : i32
    %c0_i32_0 = arith.constant 0 : i32
    %c0_i32_1 = arith.constant 0 : i32
    return %c0_i32, %c0_i32_0 : i32, i32
  }
  func.func @transform_2(%arg0: i32) -> (i32, i32) {
    %c0_i32 = arith.constant 0 : i32
    %c0_i32_0 = arith.constant 0 : i32
    %c0_i32_1 = arith.constant 0 : i32
    return %c0_i32, %c0_i32_0 : i32, i32
  }
  func.func @transform_3(%arg0: i32) -> (i32, i32) {
    %c0_i32 = arith.constant 0 : i32
    %c0_i32_0 = arith.constant 0 : i32
    return %arg0, %c0_i32 : i32, i32
  }
}

</mosaic_0001>

<bundles_post_ra>
// kernel: tpu_custom_call.1
= control target key start
LH: loop header
LB: loop body
LE: loop exit
PB: predicated region body
PF: predicated region fallthrough
CT: control target
= control target key end

     0   :  { %s396_s0 = inlined_call_operand.vmem [shape: f32[64,128], index: 0, kind: input, shape index: {}]   ;;  %s397_s1 = inlined_call_operand.vmem [shape: f32[128,160], index: 1, kind: input, shape index: {}]   ;;  %s398_s2 = inlined_call_operand.vmem [shape: f32[1,160], index: 2, kind: input, shape index: {}]   ;;  %s399_s3 = inlined_call_operand.hbm [shape: f32[64,160], index: 3, kind: output, shape index: {}]  }
   0x1   :  { %v53_v0 = vld [vmem:[%s397_s1 + $0xf0] sm:$0xff]  ;;  %v54_v1 = vld [vmem:[%s397_s1 + $0xf8] sm:$0xff]  ;;  %v51_v2 = vld [vmem:[%s397_s1 + $0xe0] sm:$0xff] }
   0x2   :  { %178 = vmatpush.msra.mxu2 %v53_v0  ;;  %194 = vmatpush.msra.mxu3 %v54_v1  ;;  %v52_v3 = vld [vmem:[%s397_s1 + $0xe8] sm:$0xff]  ;;  %v49_v4 = vld [vmem:[%s397_s1 + $0xd0] sm:$0xff]  ;;  %v50_v5 = vld [vmem:[%s397_s1 + $0xd8] sm:$0xff] }
   0x3   :  { %61 = vmatpush.msra.mxu0 %v53_v0  ;;  %102 = vmatpush.msra.mxu1 %v54_v1  ;;  %v47_v6 = vld [vmem:[%s397_s1 + $0xc0] sm:$0xff]  ;;  %v48_v7 = vld [vmem:[%s397_s1 + $0xc8] sm:$0xff]  ;;  %v45_v8 = vld [vmem:[%s397_s1 + $0xb0] sm:$0xff] }
   0x4   :  { %179 = vmatpush.msra.mxu2 %v51_v2  ;;  %195 = vmatpush.msra.mxu3 %v52_v3  ;;  %v46_v9 = vld [vmem:[%s397_s1 + $0xb8] sm:$0xff]  ;;  %v43_v10 = vld [vmem:[%s397_s1 + $0xa0] sm:$0xff]  ;;  %v44_v11 = vld [vmem:[%s397_s1 + $0xa8] sm:$0xff] }
   0x5   :  { %62 = vmatpush.msra.mxu0 %v51_v2  ;;  %103 = vmatpush.msra.mxu1 %v52_v3  ;;  %v41_v12 = vld [vmem:[%s397_s1 + $0x90] sm:$0xff]  ;;  %v42_v13 = vld [vmem:[%s397_s1 + $0x98] sm:$0xff]  ;;  %v39_v14 = vld [vmem:[%s397_s1 + $0x80] sm:$0xff] }
   0x6   :  { %180 = vmatpush.msra.mxu2 %v49_v4  ;;  %196 = vmatpush.msra.mxu3 %v50_v5  ;;  %v40_v15 = vld [vmem:[%s397_s1 + $0x88] sm:$0xff] }
   0x7   :  { %63 = vmatpush.msra.mxu0 %v49_v4  ;;  %104 = vmatpush.msra.mxu1 %v50_v5 }
   0x8   :  { %181 = vmatpush.msra.mxu2 %v47_v6  ;;  %197 = vmatpush.msra.mxu3 %v48_v7 }
   0x9   :  { %64 = vmatpush.msra.mxu0 %v47_v6  ;;  %105 = vmatpush.msra.mxu1 %v48_v7 }
   0xa   :  { %182 = vmatpush.msra.mxu2 %v45_v8  ;;  %198 = vmatpush.msra.mxu3 %v46_v9 }
   0xb   :  { %65 = vmatpush.msra.mxu0 %v45_v8  ;;  %106 = vmatpush.msra.mxu1 %v46_v9 }
   0xc   :  { %183 = vmatpush.msra.mxu2 %v43_v10  ;;  %199 = vmatpush.msra.mxu3 %v44_v11 }
   0xd   :  { %66 = vmatpush.msra.mxu0 %v43_v10  ;;  %107 = vmatpush.msra.mxu1 %v44_v11 }
   0xe   :  { %8 = vsyncpa [#allocation3], 0  ;;  %184 = vmatpush.msra.mxu2 %v41_v12  ;;  %200 = vmatpush.msra.mxu3 %v42_v13  ;;  %v37_v16 = vld [vmem:[%s397_s1 + $0x70] sm:$0xff]  ;;  %v38_v17 = vld [vmem:[%s397_s1 + $0x78] sm:$0xff]  ;;  %vm144_vm0 = vcmask 261120   ;;  %s166_s14 = sshll.u32 %s399_s3, 4  ;;  %s167_s14 = int_to_ptr.hbm [resolvable:$true] %s166_s14 }
   0xf   :  { %67 = vmatpush.msra.mxu0 %v41_v12  ;;  %108 = vmatpush.msra.mxu1 %v42_v13  ;;  %v35_v18 = vld [vmem:[%s397_s1 + $0x60] sm:$0xff]  ;;  %v36_v19 = vld [vmem:[%s397_s1 + $0x68] sm:$0xff]  ;;  %v33_v20 = vld [vmem:[%s397_s1 + $0x50] sm:$0xff]  ;;  %s240_s15 = smov 256   ;;  %s241_s16 = smov 16  }
  0x10   :  { %185 = vmatpush.msra.mxu2 %v39_v14  ;;  %201 = vmatpush.msra.mxu3 %v40_v15  ;;  %v34_v21 = vld [vmem:[%s397_s1 + $0x58] sm:$0xff]  ;;  %v31_v22 = vld [vmem:[%s397_s1 + $0x40] sm:$0xff]  ;;  %v32_v23 = vld [vmem:[%s397_s1 + $0x48] sm:$0xff] }
  0x11   :  { %68 = vmatpush.msra.mxu0 %v39_v14  ;;  %109 = vmatpush.msra.mxu1 %v40_v15  ;;  %v29_v24 = vld [vmem:[%s397_s1 + $0x30] sm:$0xff]  ;;  %v30_v25 = vld [vmem:[%s397_s1 + $0x38] sm:$0xff]  ;;  %v27_v26 = vld [vmem:[%s397_s1 + $0x20] sm:$0xff] }
  0x12   :  { %186 = vmatpush.msra.mxu2 %v37_v16  ;;  %202 = vmatpush.msra.mxu3 %v38_v17  ;;  %v28_v27 = vld [vmem:[%s397_s1 + $0x28] sm:$0xff]  ;;  %v25_v28 = vld [vmem:[%s397_s1 + $0x10] sm:$0xff]  ;;  %v26_v29 = vld [vmem:[%s397_s1 + $0x18] sm:$0xff] }
  0x13   :  { %69 = vmatpush.msra.mxu0 %v37_v16  ;;  %110 = vmatpush.msra.mxu1 %v38_v17  ;;  %v23_v30 = vld [vmem:[%s397_s1] sm:$0xff]  ;;  %v24_v31 = vld [vmem:[%s397_s1 + $0x8] sm:$0xff]  ;;  %v21_v36 = vld [vmem:[%s396_s0 + $0x30] sm:$0xff] }
  0x14   :  { %187 = vmatpush.msra.mxu2 %v35_v18  ;;  %203 = vmatpush.msra.mxu3 %v36_v19  ;;  %v19_v32 = vld [vmem:[%s396_s0 + $0x20] sm:$0xff]  ;;  %v20_v34 = vld [vmem:[%s396_s0 + $0x28] sm:$0xff]  ;;  %v17_v37 = vld [vmem:[%s396_s0 + $0x10] sm:$0xff] }
  0x15   :  { %70 = vmatpush.msra.mxu0 %v35_v18  ;;  %111 = vmatpush.msra.mxu1 %v36_v19  ;;  %v15_v33 = vld [vmem:[%s396_s0] sm:$0xff]  ;;  %v16_v35 = vld [vmem:[%s396_s0 + $0x8] sm:$0xff]  ;;  %v22_v38 = vld [vmem:[%s396_s0 + $0x38] sm:$0xff] }
  0x16   :  { %188 = vmatpush.msra.mxu2 %v33_v20  ;;  %204 = vmatpush.msra.mxu3 %v34_v21  ;;  %v18_v39 = vld [vmem:[%s396_s0 + $0x18] sm:$0xff]  ;;  %v55_v40 = vld [vmem:[%s398_s2] sm:$0x3]  ;;  %s239_s0 = smov [#allocation2]  }
  0x17   :  { %71 = vmatpush.msra.mxu0 %v33_v20  ;;  %112 = vmatpush.msra.mxu1 %v34_v21  ;;  %v57_v41 = vperm.slane %v55_v40, 0  ;;  %v58_v42 = vperm.slane %v55_v40, 1  ;;  %s164_s2 = sshll.u32 %s239_s0, 4  ;;  %s165_s2 = int_to_ptr.vmem [resolvable:$true] %s164_s2 }
  0x18   :  { %189 = vmatpush.msra.mxu2 %v31_v22  ;;  %205 = vmatpush.msra.mxu3 %v32_v23 }
  0x19   :  { %72 = vmatpush.msra.mxu0 %v31_v22  ;;  %113 = vmatpush.msra.mxu1 %v32_v23 }
  0x1a   :  { %190 = vmatpush.msra.mxu2 %v29_v24  ;;  %206 = vmatpush.msra.mxu3 %v30_v25 }
  0x1b   :  { %73 = vmatpush.msra.mxu0 %v29_v24  ;;  %114 = vmatpush.msra.mxu1 %v30_v25 }
  0x1c   :  { %191 = vmatpush.msra.mxu2 %v27_v26  ;;  %207 = vmatpush.msra.mxu3 %v28_v27 }
  0x1d   :  { %74 = vmatpush.msra.mxu0 %v27_v26  ;;  %115 = vmatpush.msra.mxu1 %v28_v27 }
  0x1e   :  { %192 = vmatpush.msra.mxu2 %v25_v28  ;;  %208 = vmatpush.msra.mxu3 %v26_v29 }
  0x1f   :  { %75 = vmatpush.msra.mxu0 %v25_v28  ;;  %116 = vmatpush.msra.mxu1 %v26_v29 }
  0x20   :  { %193 = vmatpush.msra.mxu2 %v23_v30  ;;  %209 = vmatpush.msra.mxu3 %v24_v31 }
  0x21   :  { %89 = vmatmul.f32.vlgmr.msra.gmra.mxu2 %v19_v32  ;;  %130 = vmatmul.f32.vlgmr.msra.gmra.mxu3 %v19_v32 }
  0x22   :  { %76 = vmatpush.msra.mxu0 %v23_v30  ;;  %117 = vmatpush.msra.mxu1 %v24_v31 }
  0x23   :  { %77 = vmatmul.f32.vlgmr.msra.gmra.mxu0 %v15_v33  ;;  %118 = vmatmul.f32.vlgmr.msra.gmra.mxu1 %v15_v33 }
  0x29   :  { %92 = vmatmul.f32.gmra.mxu2 %v20_v34  ;;  %133 = vmatmul.f32.gmra.mxu3 %v20_v34 }
  0x2b   :  { %80 = vmatmul.f32.gmra.mxu0 %v16_v35  ;;  %121 = vmatmul.f32.gmra.mxu1 %v16_v35 }
  0x31   :  { %95 = vmatmul.f32.gmra.mxu2 %v21_v36  ;;  %136 = vmatmul.f32.gmra.mxu3 %v21_v36 }
  0x33   :  { %83 = vmatmul.f32.gmra.mxu0 %v17_v37  ;;  %124 = vmatmul.f32.gmra.mxu1 %v17_v37 }
  0x39   :  { %98 = vmatmul.f32.gmra.mxu2 %v22_v38  ;;  %139 = vmatmul.f32.gmra.mxu3 %v22_v38 }
  0x3b   :  { %86 = vmatmul.f32.gmra.mxu0 %v18_v39  ;;  %127 = vmatmul.f32.gmra.mxu1 %v18_v39 }
  0xa0   :  { %v78_v43 = vpop.f32.mrf.mxu0  ;;  %v119_v44 = vpop.f32.mrf.mxu1 }
  0xa1   :  { %v79_v45 = vadd.f32 %v78_v43, %v57_v41  ;;  %v120_v46 = vadd.f32 %v119_v44, %v58_v42 }
  0xa3   :  { %143 = vst [vmem:[#allocation2] sm:$0xff] %v79_v45 }
  0xa4   :  { %v90_v47 = vpop.f32.mrf.mxu2  ;;  %145 = vst.msk [vmem:[#allocation2 + $0x8] sm:$0xff] %vm144_vm0, %v120_v46  ;;  %v131_v48 = vpop.f32.mrf.mxu3 }
  0xa5   :  { %v91_v49 = vadd.f32 %v90_v47, %v57_v41  ;;  %v132_v50 = vadd.f32 %v131_v48, %v58_v42 }
  0xa7   :  { %152 = vst [vmem:[#allocation2 + $0x40] sm:$0xff] %v91_v49 }
  0xa8   :  { %153 = vst.msk [vmem:[#allocation2 + $0x48] sm:$0xff] %vm144_vm0, %v132_v50  ;;  %v81_v51 = vpop.f32.mrf.mxu0  ;;  %v122_v52 = vpop.f32.mrf.mxu1 }
  0xa9   :  { %v82_v53 = vadd.f32 %v81_v51, %v57_v41  ;;  %v123_v54 = vadd.f32 %v122_v52, %v58_v42 }
  0xab   :  { %146 = vst [vmem:[#allocation2 + $0x10] sm:$0xff] %v82_v53 }
  0xac   :  { %v93_v55 = vpop.f32.mrf.mxu2  ;;  %147 = vst.msk [vmem:[#allocation2 + $0x18] sm:$0xff] %vm144_vm0, %v123_v54  ;;  %v134_v56 = vpop.f32.mrf.mxu3 }
  0xad   :  { %v94_v57 = vadd.f32 %v93_v55, %v57_v41  ;;  %v135_v58 = vadd.f32 %v134_v56, %v58_v42 }
  0xaf   :  { %154 = vst [vmem:[#allocation2 + $0x50] sm:$0xff] %v94_v57 }
  0xb0   :  { %155 = vst.msk [vmem:[#allocation2 + $0x58] sm:$0xff] %vm144_vm0, %v135_v58  ;;  %v84_v59 = vpop.f32.mrf.mxu0  ;;  %v125_v60 = vpop.f32.mrf.mxu1 }
  0xb1   :  { %v85_v61 = vadd.f32 %v84_v59, %v57_v41  ;;  %v126_v62 = vadd.f32 %v125_v60, %v58_v42 }
  0xb3   :  { %148 = vst [vmem:[#allocation2 + $0x20] sm:$0xff] %v85_v61 }
  0xb4   :  { %v96_v63 = vpop.f32.mrf.mxu2  ;;  %149 = vst.msk [vmem:[#allocation2 + $0x28] sm:$0xff] %vm144_vm0, %v126_v62  ;;  %v137_v0 = vpop.f32.mrf.mxu3 }
  0xb5   :  { %v97_v1 = vadd.f32 %v96_v63, %v57_v41  ;;  %v138_v2 = vadd.f32 %v137_v0, %v58_v42 }
  0xb7   :  { %156 = vst [vmem:[#allocation2 + $0x60] sm:$0xff] %v97_v1 }
  0xb8   :  { %157 = vst.msk [vmem:[#allocation2 + $0x68] sm:$0xff] %vm144_vm0, %v138_v2  ;;  %v87_v3 = vpop.f32.mrf.mxu0  ;;  %v128_v4 = vpop.f32.mrf.mxu1 }
  0xb9   :  { %v88_v5 = vadd.f32 %v87_v3, %v57_v41  ;;  %v129_v6 = vadd.f32 %v128_v4, %v58_v42 }
  0xbb   :  { %150 = vst [vmem:[#allocation2 + $0x30] sm:$0xff] %v88_v5 }
  0xbc   :  { %v99_v7 = vpop.f32.mrf.mxu2  ;;  %151 = vst.msk [vmem:[#allocation2 + $0x38] sm:$0xff] %vm144_vm0, %v129_v6  ;;  %v140_v8 = vpop.f32.mrf.mxu3 }
  0xbd   :  { %v100_v9 = vadd.f32 %v99_v7, %v57_v41  ;;  %v141_v10 = vadd.f32 %v140_v8, %v58_v42 }
  0xbf   :  { %158 = vst [vmem:[#allocation2 + $0x70] sm:$0xff] %v100_v9 }
  0xc0   :  { %159 = vst.msk [vmem:[#allocation2 + $0x78] sm:$0xff] %vm144_vm0, %v141_v10 }
  0xc1   :  { %172 = dma.vmem_to_hbm [thread:$0]  %s165_s2, 2048, %s167_s14, [#allocation3], %s240_s15, %s240_s15, %s241_s16  }
  0xc2   :  { %237 = dma.done.wait [#allocation3], 2048  }
  0xc3   :  { %238 = vsyncadd [#allocation3], 4294965248 }
  0xc4   :  { %177 = vsyncpa [#allocation3], 1 }

</bundles_post_ra>
